<compile_context>
chip_gen: v6e
topology: v6e:2x2x1
jax: 0.10.0
libtpu: 0.0.40
codegen_flags: <defaults>
</compile_context>

<pallas_src>
import functools

import numpy as np
import jax
import jax.numpy as jnp
from jax import lax
from jax.experimental import pallas as pl
from jax.experimental.pallas import tpu as pltpu

ALPHA = 1.0
BETA = 50.0
BASE = 0.0
_NORM_EPS_SQ = 1e-24  # == (F.normalize eps=1e-12)**2, clamp on the squared norm


# ------------------------------ fused kernel -------------------------------

def _fused_kernel(emb_ref, idx_ref, mask_ref, loss_ref, *, num_pos, num_pairs):
    """Single-invocation kernel (no grid).

    emb_ref : [2B, D]  f32  student rows stacked on top of teacher rows.
    idx_ref : [Kpad,4] i32  cols = (anchor_miner, pair_miner,
                                    anchor_maskorder, pair_maskorder);
                            padded rows hold B (out of range -> zero one-hot).
    mask_ref: [Kpad,B] f32  precomputed pos_mask[a1] / neg_mask[a2] rows in
                            miner order (index-only host preprocessing).
    loss_ref: [1,1]    f32  scalar loss in SMEM.
    """
    x = emb_ref[...]                                    # [2B, D]
    two_b = x.shape[0]
    b = two_b // 2

    # Fused student+teacher Gram: contract dim 1 of both operands so the
    # transpose folds into the MXU operand fetch (no x.T materialized).
    g = lax.dot_general(x, x, (((1,), (1,)), ((), ())),
                        preferred_element_type=jnp.float32)        # [2B, 2B]

    # Cosine normalization == F.normalize(x) @ F.normalize(x).T: scale the
    # Gram by rsqrt of its diagonal.  Mask the diagonal once; the row factor
    # comes from the axis-0 reduce of the SAME masked product (g symmetric),
    # so no second [2B,2B] multiply and no tiny-tile transpose.
    rows2 = lax.broadcasted_iota(jnp.int32, (two_b, two_b), 0)
    cols2 = lax.broadcasted_iota(jnp.int32, (two_b, two_b), 1)
    g_diag = jnp.where(rows2 == cols2, g, 0.0)
    inv_c = lax.rsqrt(jnp.maximum(jnp.sum(g_diag, axis=1, keepdims=True),
                                  _NORM_EPS_SQ))                   # [2B, 1]
    inv_r = lax.rsqrt(jnp.maximum(jnp.sum(g_diag, axis=0, keepdims=True),
                                  _NORM_EPS_SQ))                   # [1, 2B]
    gn = g * inv_c * inv_r

    s_mat = gn[0:b, 0:b]              # student cosine similarities   [B, B]
    t_mat = gn[b:two_b, b:two_b]      # teacher cosine similarities   [B, B]
    d_mat = s_mat - t_mat

    k_pad = idx_ref.shape[0]
    lanes = lax.broadcasted_iota(jnp.int32, (k_pad, b), 1)

    def onehot(col):                  # (Kpad,1) i32 -> (Kpad,B) {0,1} f32
        return jnp.where(lanes == col, 1.0, 0.0).astype(jnp.float32)

    oh_a_w = onehot(idx_ref[:, 0:1])  # anchors, miner order (weights)
    oh_p_w = onehot(idx_ref[:, 1:2])  # pair partners, miner order
    oh_a_r = onehot(idx_ref[:, 2:3])  # anchors, boolean-mask (row-major) order
    oh_p_r = onehot(idx_ref[:, 3:4])  # pair partners, boolean-mask order

    dn_rows = (((1,), (0,)), ((), ()))                 # (K,B) @ (B,B) -> (K,B)
    s_rows = lax.dot_general(oh_a_w, s_mat, dn_rows,
                             preferred_element_type=jnp.float32)   # S[a]
    d_rows = lax.dot_general(oh_a_r, d_mat, dn_rows,
                             preferred_element_type=jnp.float32)   # (S-T)[a']

    s_pair = jnp.sum(s_rows * oh_p_w, axis=1, keepdims=True)       # S[a, p]
    sq_err = jnp.sum(d_rows * oh_p_r, axis=1, keepdims=True) ** 2  # mask order

    # Unified multi-similarity weights (rows < num_pos are positive pairs):
    #   pos: 1 / (exp(alpha*(S[a,p]-base)) + sum exp(-alpha*(S[a]-S[a,p]))*mask)
    #   neg: exp(beta*(S[a,n]-base)) / (1 + sum exp(beta*(S[a]-base))*mask)
    row_ids = lax.broadcasted_iota(jnp.int32, (k_pad, 1), 0)
    is_pos = row_ids < num_pos
    coef = jnp.where(is_pos, -ALPHA, BETA)             # [Kpad, 1]
    shift = jnp.where(is_pos, s_pair, BASE)            # [Kpad, 1]
    exp_rows = jnp.exp(coef * (s_rows - shift))        # [Kpad, B]
    term_sum = jnp.sum(exp_rows * mask_ref[...], axis=1, keepdims=True)
    u = jnp.exp(coef * (s_pair - BASE))                # [Kpad, 1]
    numer = jnp.where(is_pos, 1.0, u)
    extra = jnp.where(is_pos, 1.0 / u, 1.0)
    w = numer / (extra + term_sum)                     # [Kpad, 1]

    # Weighted MSE.  1/(P+N) mean folded into the weights; padded rows have
    # all-zero one-hots -> sq_err == 0 -> contribute nothing.
    loss_ref[0, 0] = jnp.sum(sq_err * (w * (1.0 / float(num_pairs))))


# -------------------------------- wrapper -----------------------------------

@functools.partial(jax.jit, static_argnames=("num_pos", "num_pairs"))
def _loss_call(emb, idx, mask_rows, *, num_pos, num_pairs):
    kernel = functools.partial(_fused_kernel,
                               num_pos=num_pos, num_pairs=num_pairs)
    return pl.pallas_call(
        kernel,
        out_shape=jax.ShapeDtypeStruct((1, 1), jnp.float32),
        in_specs=[
            pl.BlockSpec(memory_space=pltpu.MemorySpace.VMEM),   # stacked emb
            pl.BlockSpec(memory_space=pltpu.MemorySpace.VMEM),   # packed idx
            pl.BlockSpec(memory_space=pltpu.MemorySpace.VMEM),   # mask rows
        ],
        out_specs=pl.BlockSpec(memory_space=pltpu.MemorySpace.SMEM),
        # Explicit scoped-VMEM budget (matters only if B/D grow; the small
        # test config uses well under 1 MiB).  Safe on v5e/v6e/v7x.
        compiler_params=pltpu.CompilerParams(
            vmem_limit_bytes=32 * 1024 * 1024),
    )(emb, idx, mask_rows)


def ms_weighted_rkd_mse(student, teacher, miner_outputs):
    """Forward pass of MultiSimilarityWeightedRKdAngle_MSE (fused Pallas)."""
    a1, p, a2, n = miner_outputs
    a1 = np.asarray(a1, np.int64)
    p = np.asarray(p, np.int64)
    a2 = np.asarray(a2, np.int64)
    n = np.asarray(n, np.int64)

    b, _ = student.shape
    p_cnt = int(a1.size)
    n_cnt = int(a2.size)
    k = p_cnt + n_cnt
    k_pad = ((k + 7) // 8) * 8

    # Host / trace-time index-only preprocessing (no embedding data touched):
    # PyTorch extracts relations via boolean masks (row-major order) but pairs
    # them with miner-order weights; reorder the index lists into mask order
    # and precompute the pos_mask[a1] / neg_mask[a2] rows.
    order_p = np.argsort(a1 * b + p, kind="stable")
    order_n = np.argsort(a2 * b + n, kind="stable")
    # TODO(synk): duplicate miner pairs would be de-duplicated by PyTorch's
    #             boolean masks; unique pairs are assumed here (static shapes).

    idx = np.full((k_pad, 4), b, dtype=np.int32)       # pad -> out-of-range
    idx[:p_cnt, 0] = a1
    idx[p_cnt:k, 0] = a2
    idx[:p_cnt, 1] = p
    idx[p_cnt:k, 1] = n
    idx[:p_cnt, 2] = a1[order_p]
    idx[p_cnt:k, 2] = a2[order_n]
    idx[:p_cnt, 3] = p[order_p]
    idx[p_cnt:k, 3] = n[order_n]

    pos_full = np.zeros((b, b), np.float32)
    pos_full[a1, p] = 1.0
    neg_full = np.zeros((b, b), np.float32)
    neg_full[a2, n] = 1.0
    mask_rows = np.zeros((k_pad, b), np.float32)
    mask_rows[:p_cnt] = pos_full[a1]
    mask_rows[p_cnt:k] = neg_full[a2]

    emb = jnp.concatenate([jnp.asarray(student, jnp.float32),
                           jnp.asarray(teacher, jnp.float32)], axis=0)
    loss = _loss_call(emb, jnp.asarray(idx), jnp.asarray(mask_rows),
                      num_pos=p_cnt, num_pairs=k)
    return loss[0, 0]


# --------------------------- numpy f64 reference ----------------------------

def reference(student, teacher, miner_outputs):
    a1, p, a2, n = (np.asarray(v) for v in miner_outputs)
    xs = np.asarray(student, dtype=np.float64)
    xt = np.asarray(teacher, dtype=np.float64)
    xs = xs / np.maximum(np.linalg.norm(xs, axis=1, keepdims=True), 1e-12)
    xt = xt / np.maximum(np.linalg.norm(xt, axis=1, keepdims=True), 1e-12)
    S = xs @ xs.T
    T = xt @ xt.T
    B = S.shape[0]
    pos_mask = np.zeros((B, B), dtype=bool); pos_mask[a1, p] = True
    neg_mask = np.zeros((B, B), dtype=bool); neg_mask[a2, n] = True
    term1 = np.exp(-ALPHA * (BASE - S[a1, p]))
    term2 = (np.exp(-ALPHA * (S[a1] - S[a1, p][:, None])) * pos_mask[a1]).sum(1)
    pos_w = 1.0 / (term1 + term2)
    num = np.exp(BETA * (S[a2, n] - BASE))
    den = (np.exp(BETA * (S[a2] - BASE)) * neg_mask[a2]).sum(1)
    neg_w = num / (1.0 + den)
    w = np.concatenate([pos_w, neg_w])
    s_rel = np.concatenate([S[pos_mask], S[neg_mask]])   # row-major extraction
    t_rel = np.concatenate([T[pos_mask], T[neg_mask]])
    return float(np.mean((s_rel - t_rel) ** 2 * w))


# ---------------------------------- main ------------------------------------

if __name__ == "__main__":
    key = jax.random.PRNGKey(0)
    B, D = 16, 384
    k1, k2 = jax.random.split(key)
    student = jax.random.normal(k1, (B, D), jnp.float32)
    teacher = jax.random.normal(k2, (B, D), jnp.float32)

    # Deterministic, unique miner pairs with repeated anchors and a miner
    # order that differs from row-major order (exercises the mask-order
    # relation gathering and the precomputed mask rows).
    a1 = np.array([3, 1, 7, 3, 5, 1, 6, 4], dtype=np.int32)
    p = np.array([4, 2, 8, 9, 6, 11, 7, 5], dtype=np.int32)
    a2 = np.array([2, 9, 4, 2, 11, 7, 9, 0, 5, 2, 8, 1], dtype=np.int32)
    n = np.array([7, 3, 10, 14, 5, 12, 8, 6, 13, 0, 1, 9], dtype=np.int32)
    miner_outputs = (a1, p, a2, n)

    loss = ms_weighted_rkd_mse(student, teacher, miner_outputs)
    jax.block_until_ready(loss)

    ref = reference(student, teacher, miner_outputs)
    # exp(BETA * s) with BETA=50 amplifies f32 rounding; keep a modest rtol.
    assert np.isclose(float(loss), ref, rtol=5e-4, atol=1e-6), (float(loss), ref)

    print("KERNEL_OK")
</pallas_src>

<mosaic_0001>
module attributes {stable_mosaic.version = 11 : i64} {
  func.func @_fused_kernel(%arg0: memref<32x384xf32, #tpu.memory_space<vmem>>, %arg1: memref<24x4xi32, #tpu.memory_space<vmem>>, %arg2: memref<24x16xf32, #tpu.memory_space<vmem>>, %arg3: memref<1x1xf32, #tpu.memory_space<smem>>) attributes {dimension_semantics = [], scalar_prefetch = 0 : i64, scratch_operands = 0 : i64, tpu.core_type = #tpu.core_type<tc>} {
    %c0 = arith.constant 0 : index
    %c0_0 = arith.constant 0 : index
    %0 = vector.load %arg0[%c0, %c0_0] : memref<32x384xf32, #tpu.memory_space<vmem>>, vector<32x384xf32>
    %cst = arith.constant dense<0.000000e+00> : vector<32x32xf32>
    %1 = tpu.matmul %0, %0, %cst {dimension_numbers = #tpu.dot_dimension_numbers<[1], [1], [0], [0], [0, 0, 1, 0], [], []>} : vector<32x384xf32>, vector<32x384xf32>, vector<32x32xf32> -> vector<32x32xf32>
    %2 = tpu.iota {dimensions = array<i32: 0>} : vector<32x32xi32>
    %3 = tpu.iota {dimensions = array<i32: 1>} : vector<32x32xi32>
    %4 = arith.cmpi eq, %2, %3 : vector<32x32xi32>
    %cst_1 = arith.constant 0.000000e+00 : f32
    %5 = vector.broadcast %cst_1 : f32 to vector<32x32xf32>
    %6 = arith.select %4, %1, %5 : vector<32x32xi1>, vector<32x32xf32>
    %cst_2 = arith.constant dense<0.000000e+00> : vector<32xf32>
    %7 = vector.multi_reduction <add>, %6, %cst_2 [1] : vector<32x32xf32> to vector<32xf32>
    %8 = vector.shape_cast %7 : vector<32xf32> to vector<32x1xf32>
    %cst_3 = arith.constant 1.000000e-24 : f32
    %9 = vector.broadcast %cst_3 : f32 to vector<32x1xf32>
    %10 = arith.maximumf %8, %9 : vector<32x1xf32>
    %11 = math.rsqrt %10 : vector<32x1xf32>
    %cst_4 = arith.constant dense<0.000000e+00> : vector<32xf32>
    %12 = vector.multi_reduction <add>, %6, %cst_4 [0] : vector<32x32xf32> to vector<32xf32>
    %13 = vector.shape_cast %12 : vector<32xf32> to vector<1x32xf32>
    %cst_5 = arith.constant 1.000000e-24 : f32
    %14 = vector.broadcast %cst_5 : f32 to vector<1x32xf32>
    %15 = arith.maximumf %13, %14 : vector<1x32xf32>
    %16 = math.rsqrt %15 : vector<1x32xf32>
    %17 = vector.broadcast %11 : vector<32x1xf32> to vector<32x32xf32>
    %18 = arith.mulf %1, %17 : vector<32x32xf32>
    %19 = vector.broadcast %16 : vector<1x32xf32> to vector<32x32xf32>
    %20 = arith.mulf %18, %19 : vector<32x32xf32>
    %21 = vector.extract_strided_slice %20 {offsets = [0, 0], sizes = [16, 16], strides = [1, 1]} : vector<32x32xf32> to vector<16x16xf32>
    %22 = vector.extract_strided_slice %20 {offsets = [16, 16], sizes = [16, 16], strides = [1, 1]} : vector<32x32xf32> to vector<16x16xf32>
    %23 = arith.subf %21, %22 : vector<16x16xf32>
    %24 = tpu.iota {dimensions = array<i32: 1>} : vector<24x16xi32>
    %c0_6 = arith.constant 0 : index
    %c0_7 = arith.constant 0 : index
    %25 = vector.load %arg1[%c0_6, %c0_7] : memref<24x4xi32, #tpu.memory_space<vmem>>, vector<24x1xi32>
    %26 = vector.broadcast %25 : vector<24x1xi32> to vector<24x16xi32>
    %27 = arith.cmpi eq, %24, %26 : vector<24x16xi32>
    %cst_8 = arith.constant 1.000000e+00 : f32
    %cst_9 = arith.constant 0.000000e+00 : f32
    %28 = vector.broadcast %cst_8 : f32 to vector<24x16xf32>
    %29 = vector.broadcast %cst_9 : f32 to vector<24x16xf32>
    %30 = arith.select %27, %28, %29 : vector<24x16xi1>, vector<24x16xf32>
    %c0_10 = arith.constant 0 : index
    %c1 = arith.constant 1 : index
    %31 = vector.load %arg1[%c0_10, %c1] : memref<24x4xi32, #tpu.memory_space<vmem>>, vector<24x1xi32>
    %32 = vector.broadcast %31 : vector<24x1xi32> to vector<24x16xi32>
    %33 = arith.cmpi eq, %24, %32 : vector<24x16xi32>
    %cst_11 = arith.constant 1.000000e+00 : f32
    %cst_12 = arith.constant 0.000000e+00 : f32
    %34 = vector.broadcast %cst_11 : f32 to vector<24x16xf32>
    %35 = vector.broadcast %cst_12 : f32 to vector<24x16xf32>
    %36 = arith.select %33, %34, %35 : vector<24x16xi1>, vector<24x16xf32>
    %c0_13 = arith.constant 0 : index
    %c2 = arith.constant 2 : index
    %37 = vector.load %arg1[%c0_13, %c2] : memref<24x4xi32, #tpu.memory_space<vmem>>, vector<24x1xi32>
    %38 = vector.broadcast %37 : vector<24x1xi32> to vector<24x16xi32>
    %39 = arith.cmpi eq, %24, %38 : vector<24x16xi32>
    %cst_14 = arith.constant 1.000000e+00 : f32
    %cst_15 = arith.constant 0.000000e+00 : f32
    %40 = vector.broadcast %cst_14 : f32 to vector<24x16xf32>
    %41 = vector.broadcast %cst_15 : f32 to vector<24x16xf32>
    %42 = arith.select %39, %40, %41 : vector<24x16xi1>, vector<24x16xf32>
    %c0_16 = arith.constant 0 : index
    %c3 = arith.constant 3 : index
    %43 = vector.load %arg1[%c0_16, %c3] : memref<24x4xi32, #tpu.memory_space<vmem>>, vector<24x1xi32>
    %44 = vector.broadcast %43 : vector<24x1xi32> to vector<24x16xi32>
    %45 = arith.cmpi eq, %24, %44 : vector<24x16xi32>
    %cst_17 = arith.constant 1.000000e+00 : f32
    %cst_18 = arith.constant 0.000000e+00 : f32
    %46 = vector.broadcast %cst_17 : f32 to vector<24x16xf32>
    %47 = vector.broadcast %cst_18 : f32 to vector<24x16xf32>
    %48 = arith.select %45, %46, %47 : vector<24x16xi1>, vector<24x16xf32>
    %cst_19 = arith.constant dense<0.000000e+00> : vector<24x16xf32>
    %49 = tpu.matmul %30, %21, %cst_19 {dimension_numbers = #tpu.dot_dimension_numbers<[1], [0], [0], [1], [0, 0, 1, 1], [], []>} : vector<24x16xf32>, vector<16x16xf32>, vector<24x16xf32> -> vector<24x16xf32>
    %cst_20 = arith.constant dense<0.000000e+00> : vector<24x16xf32>
    %50 = tpu.matmul %42, %23, %cst_20 {dimension_numbers = #tpu.dot_dimension_numbers<[1], [0], [0], [1], [0, 0, 1, 1], [], []>} : vector<24x16xf32>, vector<16x16xf32>, vector<24x16xf32> -> vector<24x16xf32>
    %51 = arith.mulf %49, %36 : vector<24x16xf32>
    %cst_21 = arith.constant dense<0.000000e+00> : vector<24xf32>
    %52 = vector.multi_reduction <add>, %51, %cst_21 [1] : vector<24x16xf32> to vector<24xf32>
    %53 = vector.shape_cast %52 : vector<24xf32> to vector<24x1xf32>
    %54 = arith.mulf %50, %48 : vector<24x16xf32>
    %cst_22 = arith.constant dense<0.000000e+00> : vector<24xf32>
    %55 = vector.multi_reduction <add>, %54, %cst_22 [1] : vector<24x16xf32> to vector<24xf32>
    %56 = vector.shape_cast %55 : vector<24xf32> to vector<24x1xf32>
    %57 = arith.mulf %56, %56 : vector<24x1xf32>
    %58 = tpu.iota {dimensions = array<i32: 0>} : vector<24x1xi32>
    %c8_i32 = arith.constant 8 : i32
    %59 = vector.broadcast %c8_i32 : i32 to vector<24x1xi32>
    %60 = arith.cmpi slt, %58, %59 : vector<24x1xi32>
    %cst_23 = arith.constant -1.000000e+00 : f32
    %cst_24 = arith.constant 5.000000e+01 : f32
    %61 = vector.broadcast %cst_23 : f32 to vector<24x1xf32>
    %62 = vector.broadcast %cst_24 : f32 to vector<24x1xf32>
    %63 = arith.select %60, %61, %62 : vector<24x1xi1>, vector<24x1xf32>
    %cst_25 = arith.constant 0.000000e+00 : f32
    %64 = vector.broadcast %cst_25 : f32 to vector<24x1xf32>
    %65 = arith.select %60, %53, %64 : vector<24x1xi1>, vector<24x1xf32>
    %66 = vector.broadcast %65 : vector<24x1xf32> to vector<24x16xf32>
    %67 = arith.subf %49, %66 : vector<24x16xf32>
    %68 = vector.broadcast %63 : vector<24x1xf32> to vector<24x16xf32>
    %69 = arith.mulf %68, %67 : vector<24x16xf32>
    %70 = math.exp %69 : vector<24x16xf32>
    %c0_26 = arith.constant 0 : index
    %c0_27 = arith.constant 0 : index
    %71 = vector.load %arg2[%c0_26, %c0_27] : memref<24x16xf32, #tpu.memory_space<vmem>>, vector<24x16xf32>
    %72 = arith.mulf %70, %71 : vector<24x16xf32>
    %cst_28 = arith.constant dense<0.000000e+00> : vector<24xf32>
    %73 = vector.multi_reduction <add>, %72, %cst_28 [1] : vector<24x16xf32> to vector<24xf32>
    %74 = vector.shape_cast %73 : vector<24xf32> to vector<24x1xf32>
    %cst_29 = arith.constant 0.000000e+00 : f32
    %75 = vector.broadcast %cst_29 : f32 to vector<24x1xf32>
    %76 = arith.subf %53, %75 : vector<24x1xf32>
    %77 = arith.mulf %63, %76 : vector<24x1xf32>
    %78 = math.exp %77 : vector<24x1xf32>
    %cst_30 = arith.constant 1.000000e+00 : f32
    %79 = vector.broadcast %cst_30 : f32 to vector<24x1xf32>
    %80 = arith.select %60, %79, %78 : vector<24x1xi1>, vector<24x1xf32>
    %cst_31 = arith.constant 1.000000e+00 : f32
    %81 = vector.broadcast %cst_31 : f32 to vector<24x1xf32>
    %82 = arith.divf %81, %78 : vector<24x1xf32>
    %cst_32 = arith.constant 1.000000e+00 : f32
    %83 = vector.broadcast %cst_32 : f32 to vector<24x1xf32>
    %84 = arith.select %60, %82, %83 : vector<24x1xi1>, vector<24x1xf32>
    %85 = arith.addf %84, %74 : vector<24x1xf32>
    %86 = arith.divf %80, %85 : vector<24x1xf32>
    %cst_33 = arith.constant 5.000000e-02 : f32
    %87 = vector.broadcast %cst_33 : f32 to vector<24x1xf32>
    %88 = arith.mulf %86, %87 : vector<24x1xf32>
    %89 = arith.mulf %57, %88 : vector<24x1xf32>
    %90 = vector.shape_cast %89 : vector<24x1xf32> to vector<1x24x1xf32>
    %cst_34 = arith.constant dense<0.000000e+00> : vector<1xf32>
    %91 = vector.multi_reduction <add>, %90, %cst_34 [1, 2] : vector<1x24x1xf32> to vector<1xf32>
    %92 = vector.shape_cast %91 : vector<1xf32> to vector<1x1x1xf32>
    %93 = vector.extract %92[0, 0, 0] : f32 from vector<1x1x1xf32>
    %c0_35 = arith.constant 0 : index
    %c0_36 = arith.constant 0 : index
    %94 = memref.load %arg3[%c0_35, %c0_36] : memref<1x1xf32, #tpu.memory_space<smem>>
    memref.store %93, %arg3[%c0_35, %c0_36] : memref<1x1xf32, #tpu.memory_space<smem>>
    return
  }
}

</mosaic_0001>

<bundles_post_ra>
// kernel: _loss_call.1
= control target key start
LH: loop header
LB: loop body
LE: loop exit
PB: predicated region body
PF: predicated region fallthrough
CT: control target
= control target key end

     0   :  { %8 = vsyncpa [#allocation3], 0  ;;  %s953_s0 = inlined_call_operand.hbm [shape: f32[32,384], index: 0, kind: input, shape index: {}]   ;;  %s954_s1 = inlined_call_operand.vmem [shape: s32[24,4], index: 1, kind: input, shape index: {}]   ;;  %s955_s2 = inlined_call_operand.vmem [shape: f32[24,16], index: 2, kind: input, shape index: {}]   ;;  %s956_s3 = inlined_call_operand.hbm [shape: f32[1,1], index: 3, kind: output, shape index: {}]  }
   0x1   :  { %9 = vsyncpa [#allocation4], 0  ;;  %s797_s12 = smov [#allocation2]  }
   0x2   :  { %s15_s13 = sshll.u32 %s797_s12, 4  ;;  %s16_s13 = int_to_ptr.vmem [resolvable:$true] %s15_s13 }
   0x3   :  { %s773_s14 = scalar_lea.vmem %s16_s13, 1536  ;;  %p778_p1 = scmp.lt.s32.totalorder %s16_s13, %s16_s13 }
   0x4   :  { %p774_p0 = scmp.ne.s32.totalorder %s16_s13, %s773_s14  ;;  %p779_p2 = scmp.lt.s32.totalorder %s773_s14, %s773_s14 }
   0x6   :  { %p780_p3 = por %p779_p2, %p778_p1 }
   0x8   :  { %p781_p4 = pnand %p780_p3, %p774_p0 }
   0xa   :  { %784 = shalt.err (!%p781_p4)
}
   0xb   :  { %s798_s15 = smov 384   ;;  %s799_s16 = smov 24  }
   0xc   :  { %21 = dma.hbm_to_vmem [thread:$0]  %s953_s0, 1536, %s16_s13, [#allocation3], %s798_s15, %s798_s15, %s799_s16  }
   0xd   :  { %793 = dma.done.wait [#allocation3], 1536  }
   0xe   :  { %794 = vsyncadd [#allocation3], 4294965760  ;;  %v800_v0 = vmov 0   ;;  %v39_v1 = vld [vmem:[#allocation2 + $0x50] sm:$0xff]  ;;  %v40_v2 = vld [vmem:[#allocation2 + $0x58] sm:$0xff]  ;;  %v801_v14 = vmov 0.0   ;;  %v211_v15 = vlaneseq }
   0xf   :  { %729 = vset.pattern.permute.xlu1 %v800_v0  ;;  %730 = vset.pattern.permute.xlu0 %v800_v0  ;;  %v38_v3 = vld [vmem:[#allocation2 + $0x48] sm:$0xff]  ;;  %v36_v4 = vld [vmem:[#allocation2 + $0x38] sm:$0xff]  ;;  %v37_v5 = vld [vmem:[#allocation2 + $0x40] sm:$0xff]  ;;  %vm226_vm2 = vcmask 261120   ;;  %vm802_vm5 = vmmov 0   ;;  %v803_v50 = vmov 2  }
  0x10   :  { %65 = vmatprep.subr.mxu0 %v39_v1  ;;  %672 = vmatprep.subr.mxu1 %v40_v2  ;;  %v35_v6 = vld [vmem:[#allocation2 + $0x30] sm:$0xff]  ;;  %v30_v7 = vld [vmem:[#allocation2 + $0x8] sm:$0xff]  ;;  %v33_v9 = vld [vmem:[#allocation2 + $0x20] sm:$0xff]  ;;  %v212_v16 = vshrl.u32 %v211_v15, 7  ;;  %v839_v17 = vand.u32 127, %v211_v15  ;;  %v804_v51 = vmov 1  }
  0x11   :  { %66 = vmatpush1.xpose.msra.mxu0 %v38_v3  ;;  %673 = vmatpush3.xpose.msra.mxu1 %v40_v2  ;;  %v31_v8 = vld [vmem:[#allocation2 + $0x10] sm:$0xff]  ;;  %v34_v10 = vld [vmem:[#allocation2 + $0x28] sm:$0xff]  ;;  %v834_v11 = vld [vmem:[%s954_s1] sm:$0xff]  ;;  %vm339_vm7 = vcmask 130048   ;;  %s807_s30 = smov [#allocation5]  }
  0x12   :  { %67 = vmatprep.subr.mxu0 %v36_v4  ;;  %674 = vmatprep.subr.mxu1 %v37_v5  ;;  %v32_v12 = vld [vmem:[#allocation2 + $0x18] sm:$0xff]  ;;  %v29_v13 = vld [vmem:[#allocation2] sm:$0xff]  ;;  %v213_v20 = vadd.s32 8, %v212_v16  ;;  %vm218_vm0 = vcmp.eq.s32.totalorder %v212_v16, %v839_v17  ;;  %v214_v26 = vadd.s32 16, %v212_v16  ;;  %v215_v35 = vadd.s32 24, %v212_v16  ;;  %v864_v48 = vld [vmem:[%s954_s1 + $0x10] sm:$0xff] }
  0x13   :  { %105 = vmatprep.mubr.f32.mxu0 %v30_v7  ;;  %680 = vmatprep.mubr.f32.mxu1 %v31_v8  ;;  %v870_v49 = vld [vmem:[%s954_s1 + $0x8] sm:$0xff]  ;;  %s806_s1 = smov 112  }
  0x14   :  { %280 = vperm.xlu1 %729, %v834_v11   ;;  %vm219_vm1 = vcmp.eq.s32.totalorder %v213_v20, %v839_v17  ;;  %vm220_vm3 = vcmp.eq.s32.totalorder %v214_v26, %v839_v17  ;;  %vm221_vm4 = vcmp.eq.s32.totalorder %v215_v35, %v839_v17 }
  0x15   :  { %68 = vmatpush1.xpose.msra.mxu0 %v35_v6  ;;  %675 = vmatpush3.xpose.msra.mxu1 %v37_v5 }
  0x16   :  { %69 = vmatprep.subr.mxu0 %v33_v9  ;;  %676 = vmatprep.subr.mxu1 %v34_v10 }
  0x19   :  { %70 = vmatpush1.xpose.msra.mxu0 %v32_v12  ;;  %677 = vmatpush3.xpose.msra.mxu1 %v34_v10 }
  0x1a   :  { %71 = vmatprep.subr.mxu0 %v30_v7  ;;  %678 = vmatprep.subr.mxu1 %v31_v8 }
  0x1d   :  { %72 = vmatpush1.xpose.msra.mxu0 %v29_v13  ;;  %679 = vmatpush3.xpose.msra.mxu1 %v31_v8 }
  0x1e   :  { %686 = vmatprep.subr.mxu1 %v801_v14  ;;  %699 = vmatprep.subr.mxu0 %v801_v14 }
  0x20   :  { %106 = vmatmul.mubr.f32.vlgmr.msra.gmra.mxu0 %v29_v13  ;;  %681 = vmatmul.mubr.f32.vlgmr.msra.gmra.mxu1 %v34_v10 }
  0x21   :  { %110 = vmatprep.mubr.f32.mxu0 %v33_v9  ;;  %683 = vmatprep.mubr.f32.mxu1 %v37_v5 }
  0x24   :  { %111 = vmatmul.mubr.f32.gmra.mxu0 %v32_v12  ;;  %684 = vmatmul.mubr.f32.gmra.mxu1 %v40_v2 }
  0x25   :  { %115 = vmatprep.mubr.f32.mxu0 %v36_v4  ;;  %690 = vmatprep.mubr.msk.f32.mxu1 %vm802_vm5, %v801_v14 }
  0x28   :  { %116 = vmatmul.mubr.f32.gmra.mxu0 %v35_v6 }
  0x29   :  { %120 = vmatprep.mubr.f32.mxu0 %v39_v1 }
  0x2c   :  { %121 = vmatmul.mubr.f32.gmra.mxu0 %v38_v3 }
  0x2d   :  { %703 = vmatprep.mubr.msk.f32.mxu0 %vm802_vm5, %v801_v14 }
  0x8f   :  { %v281_v61 = vpop.permute.xlu1 %280 }
  0x90   :  { %vm288_vm6 = vcmp.eq.s32.totalorder %v839_v17, %v281_v61 }
  0x91   :  { %v291_v16 = vsel %vm288_vm6, 1.0, %v801_v14 }
  0xe0   :  { %v107_v18 = vpop.f32.mrf.mxu0  ;;  %v682_v19 = vpop.f32.mrf.mxu1 }
  0xe2   :  { %v109_v21 = vpop.f32.mrf.mxu0  ;;  %v192_v22 = vpop.f32.mrf.mxu1 }
  0xe3   :  { %v842_v23 = vadd.f32 %v192_v22, %v107_v18 }
  0xe4   :  { %v112_v24 = vpop.f32.mrf.mxu0  ;;  %v685_v25 = vpop.f32.mrf.mxu1 }
  0xe5   :  { %v845_v27 = vadd.f32 %v682_v19, %v112_v24  ;;  %v222_v28 = vsel %vm218_vm0, %v842_v23, 0.0  ;;  %v805_v19 = vmov 3  }
  0xe6   :  { %v114_v29 = vpop.f32.mrf.mxu0  ;;  %v202_v30 = vpop.f32.mrf.mxu1  ;;  %v227_v34 = vsel %vm226_vm2, %v222_v28, 0.0 }
  0xe7   :  { %v223_v31 = vsel %vm219_vm1, %v845_v27, 0.0 }
  0xe8   :  { %v117_v32 = vpop.f32.mrf.mxu0  ;;  %v230_v33 = vsel %vm226_vm2, %v223_v31, 0.0 }
  0xe9   :  { %v852_v36 = vadd.f32 %v202_v30, %v117_v32  ;;  %231 = vadd.xlane.f32.xlu0 %v230_v33  ;;  %v247_v37 = vadd.f32 %v230_v33, %v227_v34 }
  0xea   :  { %v119_v38 = vpop.f32.mrf.mxu0 }
  0xeb   :  { %v224_v39 = vsel %vm220_vm3, %v852_v36, 0.0  ;;  %vm617_vm3 = vcmask 7168  }
  0xec   :  { %v122_v40 = vpop.f32.mrf.mxu0  ;;  %v233_v41 = vsel %vm226_vm2, %v224_v39, 0.0 }
  0xed   :  { %v857_v42 = vadd.f32 %v685_v25, %v122_v40  ;;  %228 = vadd.xlane.f32.xlu0 %v227_v34  ;;  %v248_v43 = vadd.f32 %v247_v37, %v233_v41 }
  0xee   :  { %v124_v44 = vpop.f32.mrf.mxu0 }
  0xef   :  { %v225_v45 = vsel %vm221_vm4, %v857_v42, 0.0 }
  0xf0   :  { %v236_v46 = vsel %vm226_vm2, %v225_v45, 0.0 }
  0xf1   :  { %234 = vadd.xlane.f32.xlu0 %v233_v41  ;;  %237 = vadd.xlane.f32.xlu1 %v236_v46  ;;  %v249_v47 = vadd.f32 %v248_v43, %v236_v46 }
  0xf3   :  { %v250_v52 = vrot.slane %v249_v47, 4 }
  0xf5   :  { %v251_v53 = vadd.f32 %v250_v52, %v249_v47 }
  0xf7   :  { %v252_v54 = vrot.slane %v251_v53, 2 }
  0xf9   :  { %v253_v55 = vadd.f32 %v252_v54, %v251_v53 }
  0xfb   :  { %v254_v56 = vrot.slane %v253_v55, 1 }
  0xfd   :  { %v255_v57 = vadd.f32 %v254_v56, %v253_v55  ;;  %v567_v55 = vld [vmem:[%s955_s2 + $0x8] sm:$0xff] }
  0xff   :  { %v256_v59 = vmax.f32 %v255_v57, 1e-24 }
 0x102   :  { %286 = vperm.xlu1 %729, %v864_v48  }
 0x106   :  { %732 = vset.pattern.permute.xlu1 %v803_v50 }
 0x107   :  { %283 = vperm.xlu0 %730, %v870_v49  }
 0x10b   :  { %731 = vset.pattern.permute.xlu0 %v803_v50 }
 0x10c   :  { %310 = vperm.xlu0 %731, %v834_v11  }
 0x110   :  { %313 = vperm.xlu0 %731, %v870_v49  }
 0x114   :  { %733 = vset.pattern.permute.xlu0 %v804_v51 }
 0x115   :  { %295 = vperm.xlu0 %733, %v834_v11  }
 0x119   :  { %298 = vperm.xlu0 %733, %v870_v49  }
 0x11d   :  { %301 = vperm.xlu0 %733, %v864_v48  }
 0x121   :  { %734 = vset.pattern.permute.xlu0 %v805_v19 }
 0x122   :  { %325 = vperm.xlu0 %734, %v834_v11  }
 0x126   :  { %328 = vperm.xlu0 %734, %v870_v49  }
 0x12a   :  { %331 = vperm.xlu0 %734, %v864_v48  }
 0x172   :  { %v232_v58 = vpop.xlane.xlu0 %231 }
 0x173   :  { %v240_v60 = vmax.f32 %v232_v58, 1e-24 }
 0x175   :  { %735 = vrsqrt.f32 %v240_v60 }
 0x176   :  { %v229_v62 = vpop.xlane.xlu0 %228  ;;  %737 = vrsqrt.f32 %v256_v59 }
 0x177   :  { %v239_v63 = vmax.f32 %v229_v62, 1e-24 }
 0x179   :  { %739 = vrsqrt.f32 %v239_v63 }
 0x17a   :  { %v235_v0 = vpop.xlane.xlu0 %234  ;;  %v238_v1 = vpop.xlane.xlu1 %237 }
 0x17b   :  { %v241_v2 = vmax.f32 %v235_v0, 1e-24  ;;  %v242_v3 = vmax.f32 %v238_v1, 1e-24 }
 0x17d   :  { %741 = vrsqrt.f32 %v241_v2 }
 0x17e   :  { %743 = vrsqrt.f32 %v242_v3  ;;  %v287_v20 = vpop.permute.xlu1 %286 }
 0x17f   :  { %vm290_vm9 = vcmp.eq.s32.totalorder %v839_v17, %v287_v20 }
 0x180   :  { %v293_v25 = vsel %vm290_vm9, 1.0, %v801_v14 }
 0x182   :  { %v736_v4 = vpop.eup %735  ;;  %v284_v10 = vpop.permute.xlu0 %283 }
 0x183   :  { %v259_v5 = vmul.f32 %v736_v4, %v845_v27  ;;  %v738_v6 = vpop.eup %737  ;;  %vm289_vm8 = vcmp.eq.s32.totalorder %v839_v17, %v284_v10 }
 0x184   :  { %v292_v21 = vsel %vm289_vm8, 1.0, %v801_v14 }
 0x185   :  { %v263_v7 = vmul.f32 %v738_v6, %v259_v5 }
 0x186   :  { %v740_v8 = vpop.eup %739 }
 0x187   :  { %687 = vmatpush3.msra.mxu1 %v263_v7  ;;  %v258_v9 = vmul.f32 %v740_v8, %v842_v23  ;;  %v311_v11 = vpop.permute.xlu0 %310  ;;  %v566_v8 = vld [vmem:[%s955_s2] sm:$0xff] }
 0x188   :  { %688 = vmatprep.subr.mxu1 %v801_v14  ;;  %vm318_vm10 = vcmp.eq.s32.totalorder %v839_v17, %v311_v11 }
 0x189   :  { %v262_v12 = vmul.f32 %v738_v6, %v258_v9  ;;  %v321_v31 = vsel %vm318_vm10, 1.0, %v801_v14 }
 0x18a   :  { %v742_v13 = vpop.eup %741 }
 0x18b   :  { %v744_v15 = vpop.eup %743  ;;  %689 = vmatpush3.msra.mxu1 %v262_v12  ;;  %v260_v18 = vmul.f32 %v742_v13, %v852_v36  ;;  %v314_v29 = vpop.permute.xlu0 %313 }
 0x18c   :  { %691 = vmatmul.mubr.msk.f32.vlgmr.msra.gmra.mxu1 %vm339_vm7, %v291_v16  ;;  %712 = vmatprep.subr.mxu1 %v801_v14  ;;  %v261_v23 = vmul.f32 %v744_v15, %v857_v42  ;;  %vm319_vm11 = vcmp.eq.s32.totalorder %v839_v17, %v314_v29 }
 0x18d   :  { %v264_v22 = vmul.f32 %v738_v6, %v260_v18  ;;  %693 = vmatprep.mubr.msk.f32.mxu1 %vm802_vm5, %v801_v14  ;;  %v322_v32 = vsel %vm319_vm11, 1.0, %v801_v14 }
 0x18e   :  { %v265_v24 = vmul.f32 %v738_v6, %v261_v23 }
 0x18f   :  { %268 = vrot.lane.b32.xlu1 %v264_v22, %s806_s1 }
 0x190   :  { %694 = vmatmul.mubr.msk.f32.gmra.mxu1 %vm339_vm7, %v292_v21  ;;  %v296_v35 = vpop.permute.xlu0 %295 }
 0x191   :  { %696 = vmatprep.mubr.msk.f32.mxu1 %vm802_vm5, %v801_v14  ;;  %vm303_vm13 = vcmp.eq.s32.totalorder %v839_v17, %v296_v35 }
 0x192   :  { %v306_v37 = vsel %vm303_vm13, 1.0, %v801_v14 }
 0x193   :  { %270 = vrot.lane.b32.xlu1 %v265_v24, %s806_s1 }
 0x194   :  { %697 = vmatmul.mubr.msk.f32.gmra.mxu1 %vm339_vm7, %v293_v25  ;;  %v299_v36 = vpop.permute.xlu0 %298 }
 0x195   :  { %709 = vmatprep.mubr.msk.f32.mxu1 %vm802_vm5, %v801_v14  ;;  %vm304_vm14 = vcmp.eq.s32.totalorder %v839_v17, %v299_v36 }
 0x196   :  { %v307_v43 = vsel %vm304_vm14, 1.0, %v801_v14 }
 0x197   :  { %316 = vperm.xlu1 %732, %v864_v48  }
 0x198   :  { %v302_v40 = vpop.permute.xlu0 %301 }
 0x199   :  { %vm305_vm15 = vcmp.eq.s32.totalorder %v839_v17, %v302_v40 }
 0x19a   :  { %v308_v50 = vsel %vm305_vm15, 1.0, %v801_v14 }
 0x201   :  { %v269_v26 = vpop.permute.xlu1 %268 }
 0x202   :  { %v274_v30 = vsub.f32 %v262_v12, %v269_v26  ;;  %v568_v12 = vld [vmem:[%s955_s2 + $0x10] sm:$0xff] }
 0x205   :  { %v271_v27 = vpop.permute.xlu1 %270 }
 0x206   :  { %v275_v28 = vsub.f32 %v263_v7, %v271_v27  ;;  %v326_v7 = vpop.permute.xlu0 %325 }
 0x207   :  { %vm333_vm0 = vcmp.eq.s32.totalorder %v839_v17, %v326_v7 }
 0x208   :  { %700 = vmatpush3.msra.mxu0 %v275_v28  ;;  %714 = vmatpush3.msra.mxu1 %v275_v28  ;;  %v336_v16 = vsel %vm333_vm0, 1.0, %v801_v14 }
 0x209   :  { %701 = vmatprep.subr.mxu0 %v801_v14  ;;  %713 = vmatprep.subr.mxu1 %v801_v14 }
 0x20a   :  { %702 = vmatpush3.msra.mxu0 %v274_v30  ;;  %715 = vmatpush3.msra.mxu1 %v274_v30  ;;  %v329_v15 = vpop.permute.xlu0 %328 }
 0x20b   :  { %704 = vmatmul.mubr.msk.f32.vlgmr.msra.gmra.mxu0 %vm339_vm7, %v321_v31  ;;  %vm334_vm1 = vcmp.eq.s32.totalorder %v839_v17, %v329_v15 }
 0x20c   :  { %706 = vmatprep.mubr.msk.f32.mxu0 %vm802_vm5, %v801_v14  ;;  %v337_v21 = vsel %vm334_vm1, 1.0, %v801_v14 }
 0x20e   :  { %v332_v23 = vpop.permute.xlu0 %331 }
 0x20f   :  { %707 = vmatmul.mubr.msk.f32.gmra.mxu0 %vm339_vm7, %v322_v32  ;;  %vm335_vm2 = vcmp.eq.s32.totalorder %v839_v17, %v332_v23 }
 0x210   :  { %v338_v11 = vsel %vm335_vm2, 1.0, %v801_v14 }
 0x212   :  { %v317_v33 = vpop.permute.xlu1 %316 }
 0x213   :  { %vm320_vm12 = vcmp.eq.s32.totalorder %v839_v17, %v317_v33 }
 0x214   :  { %v323_v34 = vsel %vm320_vm12, 1.0, %v801_v14 }
 0x215   :  { %710 = vmatmul.mubr.msk.f32.vlgmr.msra.gmra.mxu1 %vm339_vm7, %v323_v34 }
 0x24c   :  { %v415_v38 = vpop.f32.mrf.mxu1 }
 0x24d   :  { %v518_v39 = vmul.f32 %v415_v38, %v306_v37 }
 0x24e   :  { %v692_v41 = vpop.f32.mrf.mxu1 }
 0x24f   :  { %v521_v42 = vsel %vm339_vm7, %v518_v39, 0.0 }
 0x250   :  { %522 = vadd.xlane.f32.xlu1 %v521_v42  ;;  %v420_v44 = vpop.f32.mrf.mxu1 }
 0x251   :  { %v519_v45 = vmul.f32 %v420_v44, %v307_v43  ;;  %v558_v46 = vmul.f32 50.0, %v420_v44 }
 0x252   :  { %v695_v47 = vpop.f32.mrf.mxu1 }
 0x253   :  { %v562_v48 = vmul.f32 1.442695, %v558_v46  ;;  %v524_v49 = vsel %vm339_vm7, %v519_v45, 0.0 }
 0x254   :  { %525 = vadd.xlane.f32.xlu0 %v524_v49  ;;  %v425_v51 = vpop.f32.mrf.mxu1 }
 0x255   :  { %745 = vpow2.f32 %v562_v48  ;;  %v520_v52 = vmul.f32 %v425_v51, %v308_v50  ;;  %v559_v0 = vmul.f32 50.0, %v425_v51 }
 0x256   :  { %v698_v53 = vpop.f32.mrf.mxu1 }
 0x257   :  { %v527_v54 = vsel %vm339_vm7, %v520_v52, 0.0  ;;  %v564_v4 = vmul.f32 1.442695, %v559_v0 }
 0x258   :  { %528 = vadd.xlane.f32.xlu1 %v527_v54 }
 0x259   :  { %747 = vpow2.f32 %v564_v4 }
 0x262   :  { %v746_v56 = vpop.eup %745 }
 0x263   :  { %v570_v57 = vmul.f32 %v746_v56, %v567_v55 }
 0x265   :  { %v575_v58 = vsel %vm339_vm7, %v570_v57, 0.0 }
 0x266   :  { %576 = vadd.xlane.f32.xlu1 %v575_v58  ;;  %v748_v9 = vpop.eup %747 }
 0x267   :  { %v571_v19 = vmul.f32 %v748_v9, %v568_v12 }
 0x269   :  { %v578_v22 = vsel %vm339_vm7, %v571_v19, 0.0 }
 0x2cb   :  { %v504_v59 = vpop.f32.mrf.mxu0 }
 0x2cc   :  { %v530_v20 = vmul.f32 %v504_v59, %v336_v16 }
 0x2cd   :  { %v705_v60 = vpop.f32.mrf.mxu0 }
 0x2ce   :  { %v533_v24 = vsel %vm339_vm7, %v530_v20, 0.0 }
 0x2cf   :  { %v509_v61 = vpop.f32.mrf.mxu0 }
 0x2d0   :  { %v531_v25 = vmul.f32 %v509_v61, %v337_v21 }
 0x2d1   :  { %v708_v62 = vpop.f32.mrf.mxu0 }
 0x2d2   :  { %v536_v26 = vsel %vm339_vm7, %v531_v25, 0.0 }
 0x2d5   :  { %v514_v63 = vpop.f32.mrf.mxu1 }
 0x2d6   :  { %v532_v27 = vmul.f32 %v514_v63, %v338_v11 }
 0x2d7   :  { %v711_v1 = vpop.f32.mrf.mxu1 }
 0x2d8   :  { %v539_v28 = vsel %vm339_vm7, %v532_v27, 0.0 }
 0x2d9   :  { %v523_v2 = vpop.xlane.xlu1 %522 }
 0x2da   :  { %v554_v3 = vsub.f32 %v415_v38, %v523_v2  ;;  %v581_v29 = vmul.f32 -1.0, %v523_v2 }
 0x2dc   :  { %v557_v5 = vmul.f32 -1.0, %v554_v3  ;;  %v584_v30 = vmul.f32 1.442695, %v581_v29 }
 0x2dd   :  { %v526_v17 = vpop.xlane.xlu0 %525 }
 0x2de   :  { %v560_v6 = vmul.f32 1.442695, %v557_v5  ;;  %v582_v34 = vmul.f32 50.0, %v526_v17 }
 0x2e0   :  { %749 = vpow2.f32 %v560_v6  ;;  %v586_v36 = vmul.f32 1.442695, %v582_v34 }
 0x2e1   :  { %751 = vpow2.f32 %v584_v30  ;;  %v529_v32 = vpop.xlane.xlu1 %528 }
 0x2e2   :  { %v583_v37 = vmul.f32 50.0, %v529_v32 }
 0x2e4   :  { %v588_v40 = vmul.f32 1.442695, %v583_v37 }
 0x2ed   :  { %v750_v10 = vpop.eup %749 }
 0x2ee   :  { %v569_v13 = vmul.f32 %v750_v10, %v566_v8  ;;  %v752_v31 = vpop.eup %751 }
 0x2ef   :  { %753 = vrcp.f32 %v752_v31  ;;  %v577_v33 = vpop.xlane.xlu1 %576 }
 0x2f0   :  { %v572_v18 = vsel %vm339_vm7, %v569_v13, 0.0  ;;  %v603_v35 = vadd.f32 1.0, %v577_v33 }
 0x2f1   :  { %573 = vadd.xlane.f32.xlu1 %v572_v18 }
 0x2f2   :  { %755 = vrcp.f32 %v603_v35 }
 0x2f3   :  { %757 = vpow2.f32 %v586_v36 }
 0x2f5   :  { %579 = vadd.xlane.f32.xlu1 %v578_v22 }
 0x2f9   :  { %534 = vadd.xlane.f32.xlu1 %v533_v24 }
 0x2fc   :  { %v754_v14 = vpop.eup %753 }
 0x2fd   :  { %537 = vadd.xlane.f32.xlu1 %v536_v26 }
 0x2ff   :  { %v756_v44 = vpop.eup %755 }
 0x300   :  { %v758_v45 = vpop.eup %757 }
 0x301   :  { %540 = vadd.xlane.f32.xlu1 %v539_v28  ;;  %v608_v47 = vmul.f32 %v758_v45, %v756_v44 }
 0x303   :  { %v612_v54 = vmul.f32 0.05, %v608_v47 }
 0x37a   :  { %v574_v38 = vpop.xlane.xlu1 %573 }
 0x37b   :  { %v602_v39 = vadd.f32 %v754_v14, %v574_v38 }
 0x37d   :  { %759 = vrcp.f32 %v602_v39 }
 0x37e   :  { %v580_v41 = vpop.xlane.xlu1 %579  ;;  %761 = vpow2.f32 %v588_v40 }
 0x37f   :  { %v604_v42 = vadd.f32 1.0, %v580_v41 }
 0x381   :  { %763 = vrcp.f32 %v604_v42 }
 0x382   :  { %v535_v43 = vpop.xlane.xlu1 %534 }
 0x383   :  { %v542_v50 = vmul.f32 %v535_v43, %v535_v43 }
 0x386   :  { %v538_v46 = vpop.xlane.xlu1 %537 }
 0x387   :  { %v543_v51 = vmul.f32 %v538_v46, %v538_v46 }
 0x389   :  { %v615_v57 = vmul.f32 %v612_v54, %v543_v51 }
 0x38a   :  { %v760_v48 = vpop.eup %759  ;;  %v541_v56 = vpop.xlane.xlu1 %540 }
 0x38b   :  { %v611_v49 = vmul.f32 0.05, %v760_v48  ;;  %v762_v52 = vpop.eup %761  ;;  %v544_v60 = vmul.f32 %v541_v56, %v541_v56  ;;  %v619_v63 = vsel %vm617_vm3, %v615_v57, 0.0 }
 0x38d   :  { %v614_v53 = vmul.f32 %v611_v49, %v542_v50 }
 0x38e   :  { %v764_v55 = vpop.eup %763 }
 0x38f   :  { %v610_v58 = vmul.f32 %v764_v55, %v762_v52  ;;  %v618_v61 = vsel %vm617_vm3, %v614_v53, 0.0 }
 0x390   :  { %v620_v0 = vadd.f32 %v619_v63, %v618_v61 }
 0x391   :  { %v613_v59 = vmul.f32 0.05, %v610_v58 }
 0x393   :  { %v616_v62 = vmul.f32 %v613_v59, %v544_v60 }
 0x395   :  { %v621_v1 = vsel %vm617_vm3, %v616_v62, 0.0 }
 0x396   :  { %v622_v2 = vadd.f32 %v621_v1, %v620_v0 }
 0x398   :  { %623 = vadd.xlane.f32.xlu0 %v622_v2 }
 0x421   :  { %v624_v3 = vpop.xlane.xlu0 %623 }
 0x422   :  { %v625_v4 = vrot.slane %v624_v3, 4 }
 0x424   :  { %v626_v5 = vadd.f32 %v625_v4, %v624_v3 }
 0x426   :  { %v627_v6 = vrot.slane %v626_v5, 2 }
 0x428   :  { %v628_v7 = vadd.f32 %v627_v6, %v626_v5 }
 0x42a   :  { %v629_v8 = vrot.slane %v628_v7, 1 }
 0x42c   :  { %v630_v9 = vadd.f32 %v629_v8, %v628_v7 }
 0x42e   :  { %716 = vpush %v630_v9 }
 0x45f   :  { %s717_s2 = spop %716 }
 0x460   :  { %633 = sst [smem:[#allocation5]] %s717_s2 }
 0x461   :  { %641 = dma.smem_to_hbm %s807_s30, 16, %s956_s3, [#allocation4]  }
 0x462   :  { %795 = dma.done.wait [#allocation4], 16  }
 0x463   :  { %796 = vsyncadd [#allocation4], 4294967280 }
 0x464   :  { %645 = sfence }
 0x465   :  { %646 = vsyncpa [#allocation3], 1 }
 0x466   :  { %647 = vsyncpa [#allocation4], 1 }

</bundles_post_ra>
